<compile_context>
chip_gen: v7x
topology: tpu7x:2x2x1
jax: 0.10.0
libtpu: 0.0.40
codegen_flags: <defaults>
</compile_context>

<pallas_src>
import functools

import jax
import jax.numpy as jnp
from jax.experimental import pallas as pl
from jax.experimental.pallas import tpu as pltpu

_VMEM_LIMIT = 64 * 1024 * 1024


def _round_up(x, m):
    return ((x + m - 1) // m) * m


def _pick_tile(full, pref, quantum):
    """Largest tile <= pref that is a multiple of `quantum` and divides `full`."""
    if full <= pref:
        return full
    t = (pref // quantum) * quantum
    while t >= quantum:
        if full % t == 0:
            return t
        t -= quantum
    return full


# -----------------------------------------------------------------------------
# Pallas kernel 1: matmul with fused bias + activation (+ optional GRU combine)
# -----------------------------------------------------------------------------
def _mm_kernel(a_ref, b_ref, bias_ref, o_ref, *, act):
    r = jnp.dot(a_ref[...], b_ref[...], preferred_element_type=jnp.float32)
    r = r + bias_ref[...]
    if act == "relu":
        r = jnp.maximum(r, 0.0)
    elif act == "tanh":
        r = jnp.tanh(r)
    elif act == "sigmoid":
        r = jax.nn.sigmoid(r)
    o_ref[...] = r.astype(o_ref.dtype)


def _mm_gru_kernel(a_ref, b_ref, bias_ref, h_ref, z_ref, o_ref):
    # q = tanh(conv_q(...)) fused with h_new = (1 - z) * h + z * q
    q = jnp.tanh(jnp.dot(a_ref[...], b_ref[...],
                         preferred_element_type=jnp.float32) + bias_ref[...])
    z = z_ref[...]
    o_ref[...] = ((1.0 - z) * h_ref[...] + z * q).astype(o_ref.dtype)


def pallas_matmul(a_bf16, w_bf16, bias_f32, act=None, gru_hz=None, tm_pref=512):
    """(M,K)bf16 @ (K,Np)bf16 + bias with fused activation (or fused GRU
    combine).  Full-K blocks (no reduction grid axis), f32 accumulation."""
    M, K = a_bf16.shape
    Kw, Np = w_bf16.shape
    assert K == Kw
    tm = min(tm_pref, _round_up(M, 8))
    Mp = _round_up(M, tm)
    tn = Np if Np <= 1024 else _pick_tile(Np, 512, 128)

    a_p = a_bf16 if Mp == M else jnp.pad(a_bf16, ((0, Mp - M), (0, 0)))

    in_specs = [
        pl.BlockSpec((tm, K), lambda i, j: (i, 0)),
        pl.BlockSpec((K, tn), lambda i, j: (0, j)),
        pl.BlockSpec((1, tn), lambda i, j: (0, j)),
    ]
    args = [a_p, w_bf16, bias_f32]

    if gru_hz is None:
        kernel = functools.partial(_mm_kernel, act=act)
    else:
        h, z = gru_hz
        assert h.shape[-1] == Np and z.shape[-1] == Np
        if Mp != M:
            h = jnp.pad(h, ((0, Mp - M), (0, 0)))
            z = jnp.pad(z, ((0, Mp - M), (0, 0)))
        in_specs += [pl.BlockSpec((tm, tn), lambda i, j: (i, j)),
                     pl.BlockSpec((tm, tn), lambda i, j: (i, j))]
        args += [h.astype(jnp.float32), z.astype(jnp.float32)]
        kernel = _mm_gru_kernel

    out = pl.pallas_call(
        kernel,
        out_shape=jax.ShapeDtypeStruct((Mp, Np), jnp.float32),
        grid_spec=pltpu.PrefetchScalarGridSpec(
            num_scalar_prefetch=0,
            grid=(Mp // tm, Np // tn),
            in_specs=in_specs,
            out_specs=pl.BlockSpec((tm, tn), lambda i, j: (i, j)),
        ),
        compiler_params=pltpu.CompilerParams(
            dimension_semantics=("parallel", "parallel"),
            vmem_limit_bytes=_VMEM_LIMIT),
    )(*args)
    return out if Mp == M else out[:M]


# -----------------------------------------------------------------------------
# Convolution via bf16 im2col + Pallas matmul
# -----------------------------------------------------------------------------
def _im2col_nhwc(x, kh, kw, stride, ph, pw):
    N, H, W, C = x.shape
    xp = jnp.pad(x, ((0, 0), (ph, ph), (pw, pw), (0, 0)))
    Ho = (H + 2 * ph - kh) // stride + 1
    Wo = (W + 2 * pw - kw) // stride + 1
    cols = []
    for i in range(kh):
        for j in range(kw):
            cols.append(xp[:, i:i + stride * Ho:stride, j:j + stride * Wo:stride, :])
    patches = jnp.stack(cols, axis=3)                     # (N, Ho, Wo, kh*kw, C)
    return patches.reshape(N * Ho * Wo, kh * kw * C), Ho, Wo


def conv2d(x, p, act=None, gru_hz=None):
    """NHWC conv as bf16 im2col + Pallas MXU matmul (fused bias/act/GRU)."""
    # TODO(synk): the im2col patch extraction is still materialized at the JAX
    # level (in bf16); fully fusing it into the matmul index_map would need
    # per-tap element-offset BlockSpecs.
    N = x.shape[0]
    a, Ho, Wo = _im2col_nhwc(x.astype(jnp.bfloat16),
                             p['kh'], p['kw'], p['stride'], p['ph'], p['pw'])
    hz = None
    if gru_hz is not None:
        h, z = gru_hz
        hz = (h.reshape(-1, h.shape[-1]), z.reshape(-1, z.shape[-1]))
    out = pallas_matmul(a, p['w'], p['b'], act=act, gru_hz=hz)
    return out[:, :p['cout']].reshape(N, Ho, Wo, p['cout'])


# -----------------------------------------------------------------------------
# Parameter init (deterministic, synthetic) with one-time weight prep
# -----------------------------------------------------------------------------
def _conv_weights(key, cout, cin, kh, kw):
    fan_in = cin * kh * kw
    w = jax.random.normal(key, (cout, cin, kh, kw), jnp.float32) / jnp.sqrt(float(fan_in))
    b = jnp.zeros((cout,), jnp.float32)
    return w, b


def _prep_conv(wb, stride=1, padding=(0, 0), fold_imgnorm=False, scale=None):
    """Pre-transpose, pad N to 128, cast to bf16 — once at init (reused every call)."""
    w, b = wb
    if fold_imgnorm:                        # 2*(x/255) - 1 folded into the conv
        b = b - w.sum(axis=(1, 2, 3))
        w = w * (2.0 / 255.0)
    if scale is not None:
        w = w * scale
        b = b * scale
    cout, cin, kh, kw = w.shape
    K = kh * kw * cin
    Np = _round_up(cout, 128)
    wm = w.transpose(2, 3, 1, 0).reshape(K, cout)
    wm = jnp.pad(wm, ((0, 0), (0, Np - cout))).astype(jnp.bfloat16)
    bp = jnp.pad(b, (0, Np - cout)).astype(jnp.float32).reshape(1, Np)
    return dict(w=wm, b=bp, kh=kh, kw=kw, stride=stride,
                ph=padding[0], pw=padding[1], cout=cout)


def init_params(key):
    keys = iter(jax.random.split(key, 64))

    def conv(cout, cin, kh, kw, **kw2):
        return _prep_conv(_conv_weights(next(keys), cout, cin, kh, kw), **kw2)

    # TODO(synk): BasicEncoder's residual blocks + instance/batch norm are not in
    # the provided snippet; approximated by a stride-8 conv stack with matching
    # output channels / strides.
    fnet = dict(
        c1=conv(64, 3, 7, 7, stride=2, padding=(3, 3), fold_imgnorm=True),
        c2=conv(96, 64, 3, 3, stride=2, padding=(1, 1)),
        c3=conv(128, 96, 3, 3, stride=2, padding=(1, 1)),
        c4=conv(256, 128, 1, 1),
    )
    cnet = dict(
        c1=conv(64, 3, 7, 7, stride=2, padding=(3, 3), fold_imgnorm=True),
        c2=conv(96, 64, 3, 3, stride=2, padding=(1, 1)),
        c3=conv(128, 96, 3, 3, stride=2, padding=(1, 1)),
        c4n=conv(128, 128, 1, 1),   # -> net  (tanh fused in matmul epilogue)
        c4i=conv(128, 128, 1, 1),   # -> inp  (relu fused in matmul epilogue)
    )
    cor_planes = 4 * (2 * 4 + 1) ** 2        # corr_levels * (2*radius+1)^2 = 324
    menc = dict(
        c1=conv(256, cor_planes, 1, 1),
        c2=conv(192, 256, 3, 3, padding=(1, 1)),
        f1=conv(128, 2, 7, 7, padding=(3, 3)),
        f2=conv(64, 128, 3, 3, padding=(1, 1)),
        conv=conv(126, 256, 3, 3, padding=(1, 1)),
    )
    gru = dict(
        z1=conv(128, 384, 1, 5, padding=(0, 2)),
        r1=conv(128, 384, 1, 5, padding=(0, 2)),
        q1=conv(128, 384, 1, 5, padding=(0, 2)),
        z2=conv(128, 384, 5, 1, padding=(2, 0)),
        r2=conv(128, 384, 5, 1, padding=(2, 0)),
        q2=conv(128, 384, 5, 1, padding=(2, 0)),
    )
    upd = dict(
        gru=gru,
        fh1=conv(256, 128, 3, 3, padding=(1, 1)),
        fh2=conv(2, 256, 3, 3, padding=(1, 1)),
        m1=conv(256, 128, 3, 3, padding=(1, 1)),
        m2=conv(64 * 9, 256, 1, 1, scale=0.25),   # 0.25 * mask folded into weights
    )
    return dict(fnet=fnet, cnet=cnet, menc=menc, upd=upd)


# -----------------------------------------------------------------------------
# Sub-modules
# -----------------------------------------------------------------------------
def fnet_forward(p, x):
    x = conv2d(x, p['c1'], act='relu')
    x = conv2d(x, p['c2'], act='relu')
    x = conv2d(x, p['c3'], act='relu')
    return conv2d(x, p['c4'])


def cnet_forward(p, x):
    x = conv2d(x, p['c1'], act='relu')
    x = conv2d(x, p['c2'], act='relu')
    x = conv2d(x, p['c3'], act='relu')
    net = conv2d(x, p['c4n'], act='tanh')     # torch.tanh(net) fused
    inp = conv2d(x, p['c4i'], act='relu')     # torch.relu(inp) fused
    return net, inp


def motion_encoder(p, flow, corr):
    cor = conv2d(corr, p['c1'], act='relu')
    cor = conv2d(cor, p['c2'], act='relu')
    flo = conv2d(flow, p['f1'], act='relu')
    flo = conv2d(flo, p['f2'], act='relu')
    out = conv2d(jnp.concatenate([cor, flo], axis=-1), p['conv'], act='relu')
    return jnp.concatenate([out, flow], axis=-1)          # 126 + 2 = 128


def sep_conv_gru(p, h, x):
    # horizontal (1x5) pass — GRU combine fused into the q-conv epilogue
    hx = jnp.concatenate([h, x], axis=-1)
    z = conv2d(hx, p['z1'], act='sigmoid')
    r = conv2d(hx, p['r1'], act='sigmoid')
    h = conv2d(jnp.concatenate([r * h, x], axis=-1), p['q1'], gru_hz=(h, z))
    # vertical (5x1) pass
    hx = jnp.concatenate([h, x], axis=-1)
    z = conv2d(hx, p['z2'], act='sigmoid')
    r = conv2d(hx, p['r2'], act='sigmoid')
    h = conv2d(jnp.concatenate([r * h, x], axis=-1), p['q2'], gru_hz=(h, z))
    return h


def update_block(p, net, inp, motion_features):
    x = jnp.concatenate([inp, motion_features], axis=-1)
    net = sep_conv_gru(p['gru'], net, x)
    d = conv2d(net, p['fh1'], act='relu')
    delta_flow = conv2d(d, p['fh2'])
    m = conv2d(net, p['m1'], act='relu')
    mask = conv2d(m, p['m2'])          # 0.25 scale already folded into weights
    return net, mask, delta_flow


# -----------------------------------------------------------------------------
# Pallas kernel 2: batched all-pairs correlation (bf16 output)
# -----------------------------------------------------------------------------
def _corr_kernel(a_ref, b_ref, o_ref, *, scale):
    c = jax.lax.dot_general(a_ref[...], b_ref[...],
                            (((1,), (1,)), ((), ())),
                            preferred_element_type=jnp.float32)
    o_ref[...] = (c * scale).astype(o_ref.dtype)


def corr_volume(f1, f2):
    """All-pairs correlation, one batched Pallas MXU kernel, bf16 output."""
    B, H, W, D = f1.shape
    HW = H * W
    a = f1.reshape(B, HW, D).astype(jnp.bfloat16)
    b = f2.reshape(B, HW, D).astype(jnp.bfloat16)
    HWp = _round_up(HW, 8)
    if HWp != HW:
        a = jnp.pad(a, ((0, 0), (0, HWp - HW), (0, 0)))
        b = jnp.pad(b, ((0, 0), (0, HWp - HW), (0, 0)))
    tq = HWp if HWp <= 512 else _pick_tile(HWp, 256, 8)
    tk = HWp if HWp <= 512 else _pick_tile(HWp, 256, 128)
    out = pl.pallas_call(
        functools.partial(_corr_kernel, scale=1.0 / float(D) ** 0.5),
        out_shape=jax.ShapeDtypeStruct((B, HWp, HWp), jnp.bfloat16),
        grid_spec=pltpu.PrefetchScalarGridSpec(
            num_scalar_prefetch=0,
            grid=(B, HWp // tq, HWp // tk),
            in_specs=[pl.BlockSpec((None, tq, D), lambda n, i, j: (n, i, 0)),
                      pl.BlockSpec((None, tk, D), lambda n, i, j: (n, j, 0))],
            out_specs=pl.BlockSpec((None, tq, tk), lambda n, i, j: (n, i, j)),
        ),
        compiler_params=pltpu.CompilerParams(
            dimension_semantics=("parallel", "parallel", "parallel"),
            vmem_limit_bytes=_VMEM_LIMIT),
    )(a, b)
    return out[:, :HW, :HW]


def _avg_pool2(x):
    B, C, H, W = x.shape
    He, We = (H // 2) * 2, (W // 2) * 2
    x = x[:, :, :He, :We]
    return x.reshape(B, C, H // 2, 2, W // 2, 2).mean(axis=(3, 5))


def bilinear_sampler(img, coords):
    # TODO(synk): data-dependent bilinear gather (F.grid_sample) kept in plain
    # JAX; a DMA-based row gather (paged-attention pattern) is the next step.
    B, C, H, W = img.shape
    x, y = coords[..., 0], coords[..., 1]
    x0 = jnp.floor(x); y0 = jnp.floor(y)
    x1 = x0 + 1.0; y1 = y0 + 1.0
    wa = (x1 - x) * (y1 - y)
    wb = (x1 - x) * (y - y0)
    wc = (x - x0) * (y1 - y)
    wd = (x - x0) * (y - y0)

    def gather(ix, iy):
        valid = (ix >= 0) & (ix <= W - 1) & (iy >= 0) & (iy <= H - 1)
        ixc = jnp.clip(ix, 0, W - 1).astype(jnp.int32)
        iyc = jnp.clip(iy, 0, H - 1).astype(jnp.int32)
        b_idx = jnp.arange(B)[:, None, None]
        vals = img[b_idx, :, iyc, ixc]                    # (B, kh, kw, C)
        return vals * valid[..., None].astype(img.dtype)

    out = (wa[..., None] * gather(x0, y0) + wb[..., None] * gather(x0, y1) +
           wc[..., None] * gather(x1, y0) + wd[..., None] * gather(x1, y1))
    return out.transpose(0, 3, 1, 2)                      # (B, C, kh, kw) f32


class CorrBlock:
    def __init__(self, fmap1, fmap2, num_levels=4, radius=4):
        self.num_levels = num_levels
        self.radius = radius
        N, H, W, D = fmap1.shape
        corr = corr_volume(fmap1, fmap2).reshape(N * H * W, 1, H, W)   # bf16
        self.pyramid = [corr]
        for _ in range(num_levels - 1):
            corr = _avg_pool2(corr)
            self.pyramid.append(corr)

    def __call__(self, coords):                            # coords NHWC (N,H,W,2)
        r = self.radius
        N, H, W, _ = coords.shape
        dx = jnp.linspace(-r, r, 2 * r + 1)
        dy = jnp.linspace(-r, r, 2 * r + 1)
        delta = jnp.stack(jnp.meshgrid(dy, dx, indexing='ij'), axis=-1)
        out_list = []
        for i in range(self.num_levels):
            corr = self.pyramid[i]
            centroid = coords.reshape(N * H * W, 1, 1, 2) / (2.0 ** i)
            coords_lvl = centroid + delta.reshape(1, 2 * r + 1, 2 * r + 1, 2)
            sampled = bilinear_sampler(corr, coords_lvl)   # (N*HW, 1, 9, 9)
            out_list.append(sampled.reshape(N, H, W, -1))
        return jnp.concatenate(out_list, axis=-1)          # NHWC (N, H, W, 324)


# -----------------------------------------------------------------------------
# RAFT_MF helpers
# -----------------------------------------------------------------------------
def coords_grid(N, H, W):
    ys, xs = jnp.meshgrid(jnp.arange(H, dtype=jnp.float32),
                          jnp.arange(W, dtype=jnp.float32), indexing='ij')
    coords = jnp.stack([xs, ys], axis=-1)                  # (H, W, 2), x first
    return jnp.broadcast_to(coords[None], (N, H, W, 2))


def initialize_flow(img):
    N, _, H, W = img.shape                                 # img is NCHW
    c0 = coords_grid(N, H // 8, W // 8)
    return c0, c0


# -----------------------------------------------------------------------------
# Pallas kernel 3: convex upsampling (softmax over 9 taps + weighted sum)
# -----------------------------------------------------------------------------
def _upsample_kernel(mask_ref, uf_ref, o_ref):
    m = mask_ref[...]                                      # (9, 64, T)
    m = m - jnp.max(m, axis=0, keepdims=True)
    e = jnp.exp(m)
    inv = pl.reciprocal(jnp.sum(e, axis=0, keepdims=True), approx=True)
    p = e * inv                                            # softmax over 9 taps
    uf = uf_ref[...]                                       # (2, 9, T)
    acc_x = p[0] * uf[0, 0][None, :]
    acc_y = p[0] * uf[1, 0][None, :]
    for t in range(1, 9):                                  # unrolled 9-tap FMA
        acc_x = acc_x + p[t] * uf[0, t][None, :]
        acc_y = acc_y + p[t] * uf[1, t][None, :]
    o_ref[0] = acc_x
    o_ref[1] = acc_y


def upsample_flow(flow, mask):
    """flow [N,H/8,W/8,2] NHWC -> [N,2,H,W] convex combination."""
    N, H, W, _ = flow.shape
    HW = H * W
    mask_r = mask.reshape(N, HW, 9, 64).transpose(0, 2, 3, 1)        # (N,9,64,HW)
    fp = jnp.pad(8.0 * flow, ((0, 0), (1, 1), (1, 1), (0, 0)))
    taps = [fp[:, i:i + H, j:j + W, :] for i in range(3) for j in range(3)]
    uf = jnp.stack(taps, axis=3)                                      # (N,H,W,9,2)
    uf = uf.transpose(0, 4, 3, 1, 2).reshape(N, 2, 9, HW)             # (N,2,9,HW)
    t_hw = HW if HW <= 512 else _pick_tile(HW, 512, 128)
    out = pl.pallas_call(
        _upsample_kernel,
        out_shape=jax.ShapeDtypeStruct((N, 2, 64, HW), jnp.float32),
        grid_spec=pltpu.PrefetchScalarGridSpec(
            num_scalar_prefetch=0,
            grid=(N, HW // t_hw),
            in_specs=[pl.BlockSpec((None, 9, 64, t_hw), lambda n, s: (n, 0, 0, s)),
                      pl.BlockSpec((None, 2, 9, t_hw), lambda n, s: (n, 0, 0, s))],
            out_specs=pl.BlockSpec((None, 2, 64, t_hw), lambda n, s: (n, 0, 0, s)),
        ),
        compiler_params=pltpu.CompilerParams(
            dimension_semantics=("parallel", "parallel"),
            vmem_limit_bytes=_VMEM_LIMIT),
    )(mask_r.astype(jnp.float32), uf.astype(jnp.float32))
    up = out.reshape(N, 2, 8, 8, H, W).transpose(0, 1, 4, 2, 5, 3)
    return up.reshape(N, 2, 8 * H, 8 * W)


# -----------------------------------------------------------------------------
# RAFT_MF forward
# -----------------------------------------------------------------------------
USE_PREV_FLOW = False
USE_MFC = False  # TODO(synk): MFC temporal aggregation module is not defined in the snippet.


def raft_mf_forward(params, images, iters=12, flow_init=None, test_mode=False):
    T = len(images)
    N = images[0].shape[0]

    # Batch all T frames through both encoders at once (bigger parallel M axis;
    # both v7x TensorCores get work).  2*(x/255)-1 is folded into the first conv.
    batched = jnp.concatenate([im.transpose(0, 2, 3, 1) for im in images], axis=0)
    fmap_all = fnet_forward(params['fnet'], batched)
    net_all, inp_all = cnet_forward(params['cnet'], batched)
    fmaps = [fmap_all[t * N:(t + 1) * N] for t in range(T)]
    nets = [net_all[t * N:(t + 1) * N] for t in range(T)]
    inps = [inp_all[t * N:(t + 1) * N] for t in range(T)]

    flow = None
    flow_up = None
    flow_predictions_list = []
    for i in range(T - 1):
        net, inp = nets[i], inps[i]
        corr_fn = CorrBlock(fmaps[i], fmaps[i + 1], num_levels=4, radius=4)
        coords0, coords1 = initialize_flow(images[i])

        fi = flow if USE_PREV_FLOW else flow_init
        if fi is not None:
            coords1 = coords1 + fi

        flow_predictions = []
        for _ in range(iters):
            corr = corr_fn(coords1)                        # (N, H/8, W/8, 324)
            flow = coords1 - coords0
            motion_features = motion_encoder(params['menc'], flow, corr)
            net, up_mask, delta_flow = update_block(params['upd'], net, inp,
                                                    motion_features)
            coords1 = coords1 + delta_flow
            flow_up = upsample_flow(coords1 - coords0, up_mask)
            flow_predictions.append(flow_up)
        flow_predictions_list.append(flow_predictions)

    if test_mode:
        return flow_up
    return flow_predictions_list


# -----------------------------------------------------------------------------
# Main
# -----------------------------------------------------------------------------
if __name__ == "__main__":
    key = jax.random.PRNGKey(0)
    k_img, k_param = jax.random.split(key)

    T, N, H, W = 2, 1, 64, 64
    images = [jax.random.uniform(jax.random.fold_in(k_img, t), (N, 3, H, W),
                                 jnp.float32, 0.0, 255.0) for t in range(T)]
    params = init_params(k_param)

    preds = raft_mf_forward(params, images, iters=2)
    leaves = jax.tree_util.tree_leaves(preds)
    for x in leaves:
        jax.block_until_ready(x)

    assert len(preds) == T - 1 and len(preds[0]) == 2
    assert preds[0][-1].shape == (N, 2, H, W)
    assert all(bool(jnp.all(jnp.isfinite(x))) for x in leaves)
    print("KERNEL_OK")
</pallas_src>

<mosaic_0001>
module attributes {stable_mosaic.version = 11 : i64} {
  func.func @_mm_kernel(%arg0: i32, %arg1: i32, %arg2: memref<512x147xbf16, #tpu.memory_space<vmem>>, %arg3: memref<147x128xbf16, #tpu.memory_space<vmem>>, %arg4: memref<1x128xf32, #tpu.memory_space<vmem>>, %arg5: memref<512x128xf32, #tpu.memory_space<vmem>>) attributes {dimension_semantics = [#tpu.dimension_semantics<parallel>, #tpu.dimension_semantics<parallel>], iteration_bounds = array<i64: 4, 1>, scalar_prefetch = 0 : i64, scratch_operands = 0 : i64, tpu.core_type = #tpu.core_type<tc>, window_params = [{transform_indices = @transform_0, window_bounds = array<i64: 512, 147>}, {transform_indices = @transform_1, window_bounds = array<i64: 147, 128>}, {transform_indices = @transform_2, window_bounds = array<i64: 1, 128>}, {transform_indices = @transform_3, window_bounds = array<i64: 512, 128>}]} {
    %c0 = arith.constant 0 : index
    %c0_0 = arith.constant 0 : index
    %0 = vector.load %arg2[%c0, %c0_0] : memref<512x147xbf16, #tpu.memory_space<vmem>>, vector<512x147xbf16>
    %c0_1 = arith.constant 0 : index
    %c0_2 = arith.constant 0 : index
    %1 = vector.load %arg3[%c0_1, %c0_2] : memref<147x128xbf16, #tpu.memory_space<vmem>>, vector<147x128xbf16>
    %cst = arith.constant dense<0.000000e+00> : vector<512x128xf32>
    %2 = tpu.matmul %0, %1, %cst {dimension_numbers = #tpu.dot_dimension_numbers<[1], [0], [0], [1], [0, 0, 1, 1], [], []>} : vector<512x147xbf16>, vector<147x128xbf16>, vector<512x128xf32> -> vector<512x128xf32>
    %c0_3 = arith.constant 0 : index
    %c0_4 = arith.constant 0 : index
    %3 = vector.load %arg4[%c0_3, %c0_4] : memref<1x128xf32, #tpu.memory_space<vmem>>, vector<1x128xf32>
    %4 = vector.broadcast %3 : vector<1x128xf32> to vector<512x128xf32>
    %5 = arith.addf %2, %4 : vector<512x128xf32>
    %cst_5 = arith.constant 0.000000e+00 : f32
    %6 = vector.broadcast %cst_5 : f32 to vector<512x128xf32>
    %7 = arith.maximumf %5, %6 : vector<512x128xf32>
    %c0_6 = arith.constant 0 : index
    %c0_7 = arith.constant 0 : index
    %8 = vector.load %arg5[%c0_6, %c0_7] : memref<512x128xf32, #tpu.memory_space<vmem>>, vector<512x128xf32>
    tpu.vector_store %arg5[%c0_6, %c0_7], %7 {strides = array<i32>} : memref<512x128xf32, #tpu.memory_space<vmem>>, vector<512x128xf32>,
    return
  }
  func.func @transform_0(%arg0: i32, %arg1: i32) -> (i32, i32) {
    %c0_i32 = arith.constant 0 : i32
    %c0_i32_0 = arith.constant 0 : i32
    return %arg0, %c0_i32 : i32, i32
  }
  func.func @transform_1(%arg0: i32, %arg1: i32) -> (i32, i32) {
    %c0_i32 = arith.constant 0 : i32
    %c0_i32_0 = arith.constant 0 : i32
    return %c0_i32, %arg1 : i32, i32
  }
  func.func @transform_2(%arg0: i32, %arg1: i32) -> (i32, i32) {
    %c0_i32 = arith.constant 0 : i32
    %c0_i32_0 = arith.constant 0 : i32
    return %c0_i32, %arg1 : i32, i32
  }
  func.func @transform_3(%arg0: i32, %arg1: i32) -> (i32, i32) {
    %c0_i32 = arith.constant 0 : i32
    return %arg0, %arg1 : i32, i32
  }
}

</mosaic_0001>

<bundles_post_ra>
// kernel: tpu_custom_call.1
= control target key start
LH: loop header
LB: loop body
LE: loop exit
PB: predicated region body
PF: predicated region fallthrough
CT: control target
= control target key end

     0   :  { %8 = vsyncpa [#allocation3], 0  ;;  %s2360_s0 = inlined_call_operand.hbm [shape: bf16[2048,147], index: 0, kind: input, shape index: {}]   ;;  %s2361_s1 = inlined_call_operand.hbm [shape: bf16[147,128], index: 1, kind: input, shape index: {}]   ;;  %s2362_s2 = inlined_call_operand.hbm [shape: f32[1,128], index: 2, kind: input, shape index: {}]   ;;  %s2363_s3 = inlined_call_operand.hbm [shape: f32[2048,128], index: 3, kind: output, shape index: {}]  }
   0x1   :  { %10 = vsyncpa [#allocation3 + $0x1], 0 }
   0x2   :  { %11 = vsyncpa [#allocation6], 0 }
   0x3   :  { %12 = vsyncpa [#allocation4], 0 }
   0x4   :  { %14 = vsyncpa [#allocation4 + $0x1], 0  ;;  %s1878_s12 = smov 0   ;;  %s1880_s13 = smov 0  }
   0x5   :  { %s1882_s14 = smov 0   ;;  %s1884_s15 = smov 0  }
   0x6   :  { %s1886_s16 = smov 0   ;;  %s1888_s17 = smov 0  }
   0x7 LB: > { %s1325_s18 = sadd.s32 4294967295, %s1844_s17   ;;  %s1326_s19 = sadd.s32 4294967294, %s1844_s17   ;;  %s1844_s17 = sphi %s1888_s17, %s20_s17   ;;  %s1840_s16 = sphi %s1886_s16, %s2385_s16   ;;  %s1836_s15 = sphi %s1884_s15, %s2384_s15   ;;  %s1832_s14 = sphi %s1882_s14, %s2383_s14   ;;  %s1828_s13 = sphi %s1880_s13, %s2382_s13   ;;  %s1824_s12 = sphi %s1878_s12, %s2381_s12  }
   0x8   : > { %p52_p0 = scmp.ne.s32.totalorder %s1828_s13, %s1824_s12  ;;  %p1912_p1 = scmp.eq.s32.totalorder %s1325_s18, 0 }
   0x9   : > { %p1916_p2 = scmp.eq.s32.totalorder %s1325_s18, 3  ;;  %p136_p3 = scmp.eq.s32.totalorder %s1326_s19, 3 }
   0xa   : > { %s2368_s20 = scalar_select %p1912_p1, 1, 0 }
   0xb   : > { %s2369_s21 = scalar_select %p1916_p2, 1, 0 }
   0xc   : > { %p1922_p4 = por %p1912_p1, %p52_p0  ;;  %p1327_p5 = scmp.ge.s32.totalorder %s1844_s17, 1 }
   0xd   : > { %p1927_p6 = por %p136_p3, %p52_p0  ;;  %p143_p7 = scmp.lt.s32.totalorder %s1844_s17, 5 }
   0xe   : > { %s2370_s22 = scalar_select %p1922_p4, 1, 0 }
   0xf   : > { %s2371_s23 = scalar_select %p1927_p6, 1, 0 }
  0x10   : > { %p1932_p8 = pnand %p1327_p5, %p143_p7  ;;  %s1846_s25 = smov [#allocation5]  }
  0x11   : > { %s157_s26 = sshll.u32 %s1846_s25, 4  ;;  %s1847_s28 = smov [#allocation7]   ;;  %s158_s26 = int_to_ptr.vmem [resolvable:$true] %s157_s26 }
  0x12   : > { %s2372_s24 = scalar_select %p1932_p8, 1, 0 }
  0x13   : > { %p1487_p9 = pneg %p1932_p8  ;;  %s173_s29 = sshll.u32 %s1847_s28, 4  ;;  %s1944_s29 = int_to_ptr.vmem [resolvable:$true] %s173_s29 }
  0x14   : > { %s1672_s5 = scalar_lea.hbm %s2361_s1, 1216 }
  0x15   : > { %p1940_p10 = pnand %p1487_p9, %p1912_p1  ;;  %p1673_p11 = scmp.ne.s32.totalorder %s2361_s1, %s1672_s5 }
  0x16   : > { %p1679_p3 = scmp.lt.u32.totalorder %s1672_s5, %s2361_s1 }
  0x17   : > { %p1674_p12 = pneg %p1940_p10 }
  0x19   : > { %p1675_p13 = pnand %p1674_p12, %p1673_p11 }
  0x1b   : > { %p1676_p0 = pneg %p1675_p13 }
  0x1d   : > { %p1681_p5 = pnand %p1679_p3, %p1676_p0 }
  0x1f   : > { %1684 = shalt.err (!%p1681_p5)
}
  0x20   : > { %s1685_s10 = scalar_lea.vmem %s158_s26, 1216  ;;  %p1693_p1 = scmp.lt.s32.totalorder %s158_s26, %s158_s26 }
  0x21   : > { %p1686_p7 = scmp.ne.s32.totalorder %s158_s26, %s1685_s10  ;;  %p1694_p4 = scmp.lt.s32.totalorder %s1685_s10, %s1685_s10 }
  0x23   : > { %p1688_p9 = pnand %p1686_p7, %p1674_p12  ;;  %p1695_p8 = por %p1694_p4, %p1693_p1 }
  0x25   : > { %p1689_p6 = pneg %p1688_p9 }
  0x27   : > { %p1696_p2 = pnand %p1695_p8, %p1689_p6 }
  0x29   : > { %1699 = shalt.err (!%p1696_p2)
}
  0x2a   : > { %s1848_s11 = smov 64   ;;  %s1849_s18 = smov 4  }
  0x2b   : > { %1490 = dma.hbm_to_vmem [thread:$0]  (!%p1940_p10), %s2361_s1, 1216, %s158_s26, [#allocation6], %s1848_s11, %s1848_s11, %s1849_s18  }
  0x2c   : > { %s1700_s4 = scalar_lea.hbm %s2362_s2, 16 }
  0x2d   : > { %p1701_p11 = scmp.ne.s32.totalorder %s2362_s2, %s1700_s4  ;;  %p1707_p4 = scmp.lt.u32.totalorder %s1700_s4, %s2362_s2 }
  0x2f   : > { %p1703_p1 = pnand %p1701_p11, %p1674_p12 }
  0x31   : > { %p1704_p2 = pneg %p1703_p1 }
  0x33   : > { %p1709_p6 = pnand %p1707_p4, %p1704_p2 }
  0x35   : > { %1712 = shalt.err (!%p1709_p6)
}
  0x36   : > { %s1713_s26 = scalar_lea.vmem %s1944_s29, 16  ;;  %s1720_s9 = scalar_lea.vmem %s1944_s29, 32 }
  0x37   : > { %p1714_p8 = scmp.ne.s32.totalorder %s1944_s29, %s1713_s26  ;;  %p1721_p3 = scmp.lt.s32.totalorder %s1944_s29, %s1944_s29 }
  0x38   : > { %p1722_p5 = scmp.lt.s32.totalorder %s1720_s9, %s1713_s26 }
  0x39   : > { %p1716_p13 = pnand %p1714_p8, %p1674_p12 }
  0x3a   : > { %p1723_p7 = por %p1722_p5, %p1721_p3 }
  0x3b   : > { %p1717_p0 = pneg %p1716_p13 }
  0x3d   : > { %p1724_p9 = pnand %p1723_p7, %p1717_p0 }
  0x3f   : > { %1727 = shalt.err (!%p1724_p9)
}
  0x40   : > { %1493 = dma.hbm_to_vmem [thread:$0]  (!%p1940_p10), %s2362_s2, 16, %s1944_s29, [#allocation6]  }
  0x41   : > { %s32_s18 = sadd.s32 1, %s1840_s16  ;;  %s39_s19 = sadd.s32 1, %s1832_s14 }
  0x42   : > { %p34_p12 = scmp.ge.s32.totalorder %s32_s18, 4  ;;  %p46_p11 = scmp.ne.s32.totalorder %s1832_s14, %s1828_s13 }
  0x43   : > { %p47_p1 = scmp.eq.s32.totalorder %s1844_s17, 0  ;;  %p1504_p2 = scmp.lt.s32.totalorder %s1844_s17, 4 }
  0x44   : > { %s2387_s18 = smov (%p34_p12, %s32_s18), 0  ;;  %p2374_p6 = scmp.ne.s32.totalorder %s2369_s21, 0 }
  0x45   : > { %p48_p4 = por %p47_p1, %p46_p11  ;;  %s36_s25 = ssub.s32 %s1840_s16, %s2387_s18 }
  0x46   : > { %p2004_p8 = por %p2374_p6, %p46_p11  ;;  %s184_s28 = sand.u32 1, %s1832_s14  }
  0x47   : > { %p37_p13 = scmp.eq.s32.totalorder %s36_s25, 0  ;;  %s1331_s29 = sshll.u32 %s184_s28, 9 }
  0x48   : > { %s1453_s30 = sshll.u32 %s1840_s16, 13  ;;  %s188_s21 = scalar_lea.vmem [#allocation2], %s1331_s29 }
  0x49   : > { %s2013_s4 = scalar_select %p37_p13, %s1832_s14, %s39_s19  }
  0x4a   : > { %s2018_s7 = scalar_lea.hbm %s2360_s0, %s1453_s30  ;;  %s196_s8 = sshll.u32 %s188_s21, 4  ;;  %s2026_s8 = int_to_ptr.vmem [resolvable:$true] %s196_s8 }
  0x4b   : > { %p2022_p10 = pnand %p1504_p2, %p48_p4  ;;  %s2028_s9 = scalar_lea.sflag [#allocation3], %s184_s28 }
  0x4c   : > { %s1728_s10 = scalar_lea.hbm %s2018_s7, 8192  ;;  %s1733_s25 = scalar_lea.hbm %s2360_s0, 32768 }
  0x4d   : > { %p1729_p0 = scmp.ne.s32.totalorder %s2018_s7, %s1728_s10  ;;  %p1730_p3 = pneg %p2022_p10 }
  0x4e   : > { %p1734_p9 = scmp.lt.u32.totalorder %s2018_s7, %s2360_s0  ;;  %p1735_p12 = scmp.lt.u32.totalorder %s1733_s25, %s1728_s10 }
  0x4f   : > { %p1731_p5 = pnand %p1730_p3, %p1729_p0  ;;  %p1737_p1 = scmp.lt.u32.totalorder %s1728_s10, %s2018_s7 }
  0x50   : > { %p1736_p11 = por %p1735_p12, %p1734_p9 }
  0x51   : > { %p1732_p7 = pneg %p1731_p5 }
  0x52   : > { %p1738_p2 = por %p1737_p1, %p1736_p11 }
  0x54   : > { %p1739_p4 = pnand %p1738_p2, %p1732_p7 }
  0x56   : > { %1742 = shalt.err (!%p1739_p4)
}
  0x57   : > { %s1743_s28 = scalar_lea.vmem %s2026_s8, 8192  ;;  %s1850_s5 = smov [#allocation2]  }
  0x58   : > { %p1744_p6 = scmp.ne.s32.totalorder %s2026_s8, %s1743_s28  ;;  %s1748_s6 = sshll.u32 %s1850_s5, 4  ;;  %s1749_s6 = int_to_ptr.vmem [resolvable:$false] %s1748_s6 }
  0x59   : > { %s1750_s21 = scalar_lea.vmem %s1749_s6, 16384  ;;  %p1751_p5 = scmp.lt.s32.totalorder %s2026_s8, %s1749_s6 }
  0x5a   : > { %p1746_p13 = pnand %p1744_p6, %p1730_p3  ;;  %p1752_p9 = scmp.lt.s32.totalorder %s1750_s21, %s1743_s28 }
  0x5c   : > { %p1747_p0 = pneg %p1746_p13  ;;  %p1753_p12 = por %p1752_p9, %p1751_p5 }
  0x5e   : > { %p1754_p11 = pnand %p1753_p12, %p1747_p0 }
  0x60   : > { %1757 = shalt.err (!%p1754_p11)
}
  0x61   : > { %s1851_s10 = smov 128   ;;  %s1852_s11 = smov 8  }
  0x62   : > { %1497 = dma.hbm_to_vmem [thread:$0]  (!%p2022_p10), %s2018_s7, 8192, %s2026_s8, %s2028_s9, %s1851_s10, %s1851_s10, %s1852_s11  }
  0x63   : > { %p2377_p3 = scmp.ne.s32.totalorder %s2372_s24, 0 }
  0x64   : > { %s2059_s19 = sand.u32 (!%p2377_p3), 1, %s1828_s13   ;;  %p2378_p7 = scmp.ne.s32.totalorder (!%p2377_p3), %s2370_s22, 0 }
  0x65   : > { %208 = sbr.rel (%p2377_p3) target bundleno = 506 (0x1fa), region = 32  ;;  %s1336_s25 = sshll.u32 (!%p2377_p3), %s2059_s19, 9 }
  0x66   : > { %s211_s29 = scalar_lea.sflag (!%p2377_p3), [#allocation3], %s2059_s19  ;;  %s2065_s30 = scalar_lea.vmem (!%p2377_p3), [#allocation2], %s1336_s25 }
  0x6c   : > { %1811 = dma.done.wait (%p2378_p7), %s211_s29, 8192  }
  0x6d   : > { %1813 = vsyncadd (%p2378_p7), %s211_s29, 4294959104  ;;  %p2379_p10 = scmp.ne.s32.totalorder %s2368_s20, 0 }
  0x6f   : > { %1815 = dma.done.wait (%p2379_p10), [#allocation6], 1232  }
  0x70   : > { %1817 = vsyncadd (%p2379_p10), [#allocation6], 4294966064  ;;  %v1853_v0 = vmov 0   ;;  %v1566_v1 = vld [vmem:[#allocation5] sm:$0xff]   ;;  %v1567_v2 = vld [vmem:[#allocation5 + $0x8] sm:$0xff]   ;;  %vm683_vm0 = vcmask 154624  }
  0x71   : > { %787 = vmatprep.subr.bf16.mxu0 %v1853_v0  ;;  %1455 = vmatprep.subr.bf16.mxu1 %v1853_v0  ;;  %v1568_v3 = vld [vmem:[#allocation5 + $0x10] sm:$0xff]   ;;  %v1569_v4 = vld [vmem:[#allocation5 + $0x18] sm:$0xff]   ;;  %v1578_v5 = vld [vmem:[%s2065_s30 + $0x4] ss:$8 sps:$4 sm:$0xff]   ;;  %vm780_vm1 = vcmask 1040384   ;;  %vm781_vm2 = vcmask 1041408  }
  0x72   : > { %788 = vmatpush1.bf16.msra.mxu0 %v1566_v1  ;;  %1465 = vmatpush1.bf16.msra.mxu1 %v1566_v1  ;;  %v1581_v6 = vld [vmem:[%s2065_s30 + $0x104] ss:$8 sps:$4 sm:$0xff]   ;;  %v1572_v9 = vld [vmem:[#allocation5 + $0x30] sm:$0xff]   ;;  %v1573_v10 = vld [vmem:[#allocation5 + $0x38] sm:$0xff]   ;;  %v1854_v11 = vmov 65535   ;;  %s2179_s20 = scalar_lea.vmem [#allocation8], %s1336_s25 }
  0x73   : > { %789 = vmatprep.subr.bf16.mxu0 %v1853_v0  ;;  %1456 = vmatprep.subr.bf16.mxu1 %v1853_v0  ;;  %v1570_v7 = vld [vmem:[#allocation5 + $0x20] sm:$0xff]   ;;  %v1571_v8 = vld [vmem:[#allocation5 + $0x28] sm:$0xff]   ;;  %v782_v12 = vsel %vm780_vm1, 4294967295, %v1854_v11  ;;  %v1582_v19 = vld [vmem:[%s2065_s30 + $0x14] ss:$8 sps:$4 sm:$0xff]   ;;  %s1454_s22 = sshll.u32 %s1836_s15, 13 }
  0x74   : > { %1415 = vmatprep.mubr.msk.bf16.mxu0 %vm683_vm0, %v1578_v5  ;;  %1431 = vmatprep.mubr.msk.bf16.mxu1 %vm683_vm0, %v1581_v6  ;;  %v1574_v13 = vld [vmem:[#allocation5 + $0x40] sm:$0xff]   ;;  %v1575_v14 = vld [vmem:[#allocation5 + $0x48] ss:$0 sps:$4 sm:$0x33]   ;;  %v783_v15 = vsel %vm781_vm2, %v782_v12, 0  ;;  %s1219_s24 = sshll.u32 %s2179_s20, 4  ;;  %s2306_s26 = scalar_lea.hbm %s2363_s3, %s1454_s22  ;;  %s2308_s24 = int_to_ptr.vmem [resolvable:$true] %s1219_s24 }
  0x75   : > { %v785_v16 = vand.u32 %v1575_v14, %v783_v15  ;;  %v1576_v17 = vld [vmem:[%s2065_s30] ss:$8 sps:$4 sm:$0xff]   ;;  %v1584_v20 = vld [vmem:[%s2065_s30 + $0x114] ss:$8 sps:$4 sm:$0xff]   ;;  %v1586_v21 = vld [vmem:[%s2065_s30 + $0x10] ss:$8 sps:$4 sm:$0xff]  }
  0x76   : > { %790 = vmatpush1.bf16.msra.mxu0 %v1567_v2  ;;  %1466 = vmatpush1.bf16.msra.mxu1 %v1567_v2  ;;  %v1579_v18 = vld [vmem:[%s2065_s30 + $0x100] ss:$8 sps:$4 sm:$0xff]   ;;  %v1587_v22 = vld [vmem:[%s2065_s30 + $0x110] ss:$8 sps:$4 sm:$0xff]   ;;  %v1588_v23 = vld [vmem:[%s2065_s30 + $0x24] ss:$8 sps:$4 sm:$0xff]  }
  0x77   : > { %791 = vmatprep.subr.bf16.mxu0 %v1853_v0  ;;  %1457 = vmatprep.subr.bf16.mxu1 %v1853_v0  ;;  %v1590_v24 = vld [vmem:[%s2065_s30 + $0x124] ss:$8 sps:$4 sm:$0xff]   ;;  %v1592_v25 = vld [vmem:[%s2065_s30 + $0x20] ss:$8 sps:$4 sm:$0xff]   ;;  %v1594_v27 = vld [vmem:[%s2065_s30 + $0x34] ss:$8 sps:$4 sm:$0xff]  }
  0x78   : > { %v1593_v26 = vld [vmem:[%s2065_s30 + $0x120] ss:$8 sps:$4 sm:$0xff]   ;;  %v1596_v28 = vld [vmem:[%s2065_s30 + $0x134] ss:$8 sps:$4 sm:$0xff]   ;;  %v1598_v29 = vld [vmem:[%s2065_s30 + $0x30] ss:$8 sps:$4 sm:$0xff]  }
  0x79   : > { %v1599_v30 = vld [vmem:[%s2065_s30 + $0x130] ss:$8 sps:$4 sm:$0xff]   ;;  %v1600_v31 = vld [vmem:[%s2065_s30 + $0x44] ss:$8 sps:$4 sm:$0xff]   ;;  %v1604_v33 = vld [vmem:[%s2065_s30 + $0x40] ss:$8 sps:$4 sm:$0xff]  }
  0x7a   : > { %792 = vmatpush1.bf16.msra.mxu0 %v1568_v3  ;;  %1467 = vmatpush1.bf16.msra.mxu1 %v1568_v3  ;;  %v1602_v32 = vld [vmem:[%s2065_s30 + $0x144] ss:$8 sps:$4 sm:$0xff]   ;;  %v1605_v34 = vld [vmem:[%s2065_s30 + $0x140] ss:$8 sps:$4 sm:$0xff]   ;;  %v1606_v35 = vld [vmem:[%s2065_s30 + $0x54] ss:$8 sps:$4 sm:$0xff]  }
  0x7b   : > { %793 = vmatprep.subr.bf16.mxu0 %v1853_v0  ;;  %1458 = vmatprep.subr.bf16.mxu1 %v1853_v0  ;;  %v1608_v36 = vld [vmem:[%s2065_s30 + $0x154] ss:$8 sps:$4 sm:$0xff]   ;;  %v1610_v37 = vld [vmem:[%s2065_s30 + $0x50] ss:$8 sps:$4 sm:$0xff]   ;;  %v1612_v39 = vld [vmem:[%s2065_s30 + $0x64] ss:$8 sps:$4 sm:$0xff]  }
  0x7c   : > { %v1611_v38 = vld [vmem:[%s2065_s30 + $0x150] ss:$8 sps:$4 sm:$0xff]   ;;  %v1614_v40 = vld [vmem:[%s2065_s30 + $0x164] ss:$8 sps:$4 sm:$0xff]   ;;  %v1616_v41 = vld [vmem:[%s2065_s30 + $0x60] ss:$8 sps:$4 sm:$0xff]  }
  0x7d   : > { %v1617_v42 = vld [vmem:[%s2065_s30 + $0x160] ss:$8 sps:$4 sm:$0xff]   ;;  %v1618_v43 = vld [vmem:[%s2065_s30 + $0x74] ss:$8 sps:$4 sm:$0xff]   ;;  %v1622_v45 = vld [vmem:[%s2065_s30 + $0x70] ss:$8 sps:$4 sm:$0xff]  }
  0x7e   : > { %794 = vmatpush1.bf16.msra.mxu0 %v1569_v4  ;;  %1468 = vmatpush1.bf16.msra.mxu1 %v1569_v4  ;;  %v1620_v44 = vld [vmem:[%s2065_s30 + $0x174] ss:$8 sps:$4 sm:$0xff]   ;;  %v1623_v46 = vld [vmem:[%s2065_s30 + $0x170] ss:$8 sps:$4 sm:$0xff]   ;;  %v1624_v47 = vld [vmem:[%s2065_s30 + $0x84] ss:$8 sps:$4 sm:$0xff]  }
  0x7f   : > { %795 = vmatprep.subr.bf16.mxu0 %v1853_v0  ;;  %1459 = vmatprep.subr.bf16.mxu1 %v1853_v0  ;;  %v1626_v48 = vld [vmem:[%s2065_s30 + $0x184] ss:$8 sps:$4 sm:$0xff]   ;;  %v1628_v49 = vld [vmem:[%s2065_s30 + $0x80] ss:$8 sps:$4 sm:$0xff]   ;;  %v1630_v51 = vld [vmem:[%s2065_s30 + $0x94] ss:$8 sps:$4 sm:$0xff]  }
  0x80   : > { %v1629_v50 = vld [vmem:[%s2065_s30 + $0x180] ss:$8 sps:$4 sm:$0xff]   ;;  %v1632_v52 = vld [vmem:[%s2065_s30 + $0x194] ss:$8 sps:$4 sm:$0xff]   ;;  %v1634_v53 = vld [vmem:[%s2065_s30 + $0x90] ss:$8 sps:$4 sm:$0xff]  }
  0x81   : > { %v1635_v54 = vld [vmem:[%s2065_s30 + $0x190] ss:$8 sps:$4 sm:$0xff]   ;;  %v1636_v55 = vld [vmem:[%s2065_s30 + $0xa4] ss:$8 sps:$4 sm:$0xff]   ;;  %v1640_v57 = vld [vmem:[%s2065_s30 + $0xa0] ss:$8 sps:$4 sm:$0xff]  }
  0x82   : > { %796 = vmatpush1.bf16.msra.mxu0 %v1570_v7  ;;  %1469 = vmatpush1.bf16.msra.mxu1 %v1570_v7  ;;  %v1638_v56 = vld [vmem:[%s2065_s30 + $0x1a4] ss:$8 sps:$4 sm:$0xff]   ;;  %v1641_v58 = vld [vmem:[%s2065_s30 + $0x1a0] ss:$8 sps:$4 sm:$0xff]   ;;  %v1642_v59 = vld [vmem:[%s2065_s30 + $0xb4] ss:$8 sps:$4 sm:$0xff]  }
  0x83   : > { %797 = vmatprep.subr.bf16.mxu0 %v1853_v0  ;;  %1460 = vmatprep.subr.bf16.mxu1 %v1853_v0  ;;  %v1644_v60 = vld [vmem:[%s2065_s30 + $0x1b4] ss:$8 sps:$4 sm:$0xff]   ;;  %v1646_v61 = vld [vmem:[%s2065_s30 + $0xb0] ss:$8 sps:$4 sm:$0xff]   ;;  %v1648_v63 = vld [vmem:[%s2065_s30 + $0xc4] ss:$8 sps:$4 sm:$0xff]  }
  0x84   : > { %v1647_v62 = vld [vmem:[%s2065_s30 + $0x1b0] ss:$8 sps:$4 sm:$0xff]   ;;  %v1652_v1 = vld [vmem:[%s2065_s30 + $0xc0] ss:$8 sps:$4 sm:$0xff]   ;;  %v1654_v3 = vld [vmem:[%s2065_s30 + $0xd4] ss:$8 sps:$4 sm:$0xff]  }
  0x85   : > { %v1653_v2 = vld [vmem:[%s2065_s30 + $0x1c0] ss:$8 sps:$4 sm:$0xff]   ;;  %v1656_v4 = vld [vmem:[%s2065_s30 + $0x1d4] ss:$8 sps:$4 sm:$0xff]   ;;  %v1658_v5 = vld [vmem:[%s2065_s30 + $0xd0] ss:$8 sps:$4 sm:$0xff]  }
  0x86   : > { %798 = vmatpush1.bf16.msra.mxu0 %v1571_v8  ;;  %1470 = vmatpush1.bf16.msra.mxu1 %v1571_v8  ;;  %v1659_v6 = vld [vmem:[%s2065_s30 + $0x1d0] ss:$8 sps:$4 sm:$0xff]   ;;  %v1660_v7 = vld [vmem:[%s2065_s30 + $0xe4] ss:$8 sps:$4 sm:$0xff]   ;;  %v1666_v11 = vld [vmem:[%s2065_s30 + $0xf4] ss:$8 sps:$4 sm:$0xff]  }
  0x87   : > { %799 = vmatprep.subr.bf16.mxu0 %v1853_v0  ;;  %1461 = vmatprep.subr.bf16.mxu1 %v1853_v0  ;;  %v1662_v8 = vld [vmem:[%s2065_s30 + $0x1e4] ss:$8 sps:$4 sm:$0xff]   ;;  %v1668_v12 = vld [vmem:[%s2065_s30 + $0x1f4] ss:$8 sps:$4 sm:$0xff]   ;;  %v1671_v14 = vld [vmem:[%s2065_s30 + $0x1f0] ss:$8 sps:$4 sm:$0xff]  }
  0x88   : > { %v2171_v15 = vld [vmem:[#allocation7] ss:$0 sm:$0xff]  ;;  %s1205_s15 = scalar_lea.sflag [#allocation4], %s2059_s19  ;;  %s1758_s9 = scalar_lea.vmem %s2308_s24, 8192 }
  0x89   : > { %p1759_p1 = scmp.ne.s32.totalorder %s2308_s24, %s1758_s9  ;;  %s1855_s28 = smov [#allocation8]  }
  0x8a   : > { %800 = vmatpush1.bf16.msra.mxu0 %v1572_v9  ;;  %1471 = vmatpush1.bf16.msra.mxu1 %v1572_v9  ;;  %v1664_v9 = vld [vmem:[%s2065_s30 + $0xe0] ss:$8 sps:$4 sm:$0xff]   ;;  %s1762_s5 = sshll.u32 %s1855_s28, 4  ;;  %s1763_s5 = int_to_ptr.vmem [resolvable:$false] %s1762_s5 }
  0x8b   : > { %801 = vmatprep.subr.bf16.mxu0 %v1853_v0  ;;  %1462 = vmatprep.subr.bf16.mxu1 %v1853_v0  ;;  %p1760_p2 = pnand %p1759_p1, %p2004_p8  ;;  %s1764_s6 = scalar_lea.vmem %s1763_s5, 16384 }
  0x8c   : > { %p1765_p6 = scmp.lt.s32.totalorder %s2308_s24, %s1763_s5  ;;  %p1766_p13 = scmp.lt.s32.totalorder %s1764_s6, %s1758_s9 }
  0x8d   : > { %p1761_p4 = pneg %p1760_p2 }
  0x8e   : > { %802 = vmatpush1.bf16.msra.mxu0 %v1573_v10  ;;  %1472 = vmatpush1.bf16.msra.mxu1 %v1573_v10  ;;  %v1665_v10 = vld [vmem:[%s2065_s30 + $0x1e0] ss:$8 sps:$4 sm:$0xff]   ;;  %p1767_p0 = por %p1766_p13, %p1765_p6 }
  0x8f   : > { %803 = vmatprep.subr.bf16.mxu0 %v1853_v0  ;;  %1463 = vmatprep.subr.bf16.mxu1 %v1853_v0 }
  0x90   : > { %p1768_p5 = pnand %p1767_p0, %p1761_p4 }
  0x92   : > { %804 = vmatpush1.bf16.msra.mxu0 %v1574_v13  ;;  %1473 = vmatpush1.bf16.msra.mxu1 %v1574_v13  ;;  %v1670_v13 = vld [vmem:[%s2065_s30 + $0xf0] ss:$8 sps:$4 sm:$0xff]  }
  0x93   : > { %805 = vmatprep.subr.bf16.mxu0 %v1853_v0  ;;  %1464 = vmatprep.subr.bf16.mxu1 %v1853_v0  ;;  %v1650_v0 = vld [vmem:[%s2065_s30 + $0x1c4] ss:$8 sps:$4 sm:$0xff]  }
  0x96   : > { %806 = vmatpush1.bf16.msra.mxu0 %v785_v16  ;;  %1474 = vmatpush1.bf16.msra.mxu1 %v785_v16 }
  0x99   : > { %820 = vmatmul.mubr.bf16.vlgmr.msra.gmra.mrb[0].mxu0 %v1576_v17  ;;  %948 = vmatmul.mubr.bf16.vlgmr.msra.gmra.mrb[0].mxu1 %v1579_v18 }
  0x9a   : > { %1416 = vmatprep.mubr.msk.bf16.mxu0 %vm683_vm0, %v1582_v19  ;;  %1432 = vmatprep.mubr.msk.bf16.mxu1 %vm683_vm0, %v1584_v20 }
  0xa1   : > { %828 = vmatmul.mubr.bf16.gmra.mrb[4].mxu0 %v1586_v21  ;;  %956 = vmatmul.mubr.bf16.gmra.mrb[4].mxu1 %v1587_v22 }
  0xa2   : > { %1417 = vmatprep.mubr.msk.bf16.mxu0 %vm683_vm0, %v1588_v23  ;;  %1433 = vmatprep.mubr.msk.bf16.mxu1 %vm683_vm0, %v1590_v24 }
  0xa9   : > { %836 = vmatmul.mubr.bf16.gmra.mrb[8].mxu0 %v1592_v25  ;;  %964 = vmatmul.mubr.bf16.gmra.mrb[8].mxu1 %v1593_v26 }
  0xaa   : > { %1418 = vmatprep.mubr.msk.bf16.mxu0 %vm683_vm0, %v1594_v27  ;;  %1434 = vmatprep.mubr.msk.bf16.mxu1 %vm683_vm0, %v1596_v28 }
  0xb1   : > { %844 = vmatmul.mubr.bf16.gmra.mrb[12].mxu0 %v1598_v29  ;;  %972 = vmatmul.mubr.bf16.gmra.mrb[12].mxu1 %v1599_v30 }
  0xb2   : > { %1419 = vmatprep.mubr.msk.bf16.mxu0 %vm683_vm0, %v1600_v31  ;;  %1435 = vmatprep.mubr.msk.bf16.mxu1 %vm683_vm0, %v1602_v32 }
  0xb9   : > { %852 = vmatmul.mubr.bf16.gmra.mrb[16].mxu0 %v1604_v33  ;;  %980 = vmatmul.mubr.bf16.gmra.mrb[16].mxu1 %v1605_v34 }
  0xba   : > { %1420 = vmatprep.mubr.msk.bf16.mxu0 %vm683_vm0, %v1606_v35  ;;  %1436 = vmatprep.mubr.msk.bf16.mxu1 %vm683_vm0, %v1608_v36 }
  0xc1   : > { %860 = vmatmul.mubr.bf16.gmra.mrb[20].mxu0 %v1610_v37  ;;  %988 = vmatmul.mubr.bf16.gmra.mrb[20].mxu1 %v1611_v38 }
  0xc2   : > { %1421 = vmatprep.mubr.msk.bf16.mxu0 %vm683_vm0, %v1612_v39  ;;  %1437 = vmatprep.mubr.msk.bf16.mxu1 %vm683_vm0, %v1614_v40 }
  0xc9   : > { %868 = vmatmul.mubr.bf16.gmra.mrb[24].mxu0 %v1616_v41  ;;  %996 = vmatmul.mubr.bf16.gmra.mrb[24].mxu1 %v1617_v42 }
  0xca   : > { %1422 = vmatprep.mubr.msk.bf16.mxu0 %vm683_vm0, %v1618_v43  ;;  %1438 = vmatprep.mubr.msk.bf16.mxu1 %vm683_vm0, %v1620_v44 }
  0xd1   : > { %876 = vmatmul.mubr.bf16.gmra.mrb[28].mxu0 %v1622_v45  ;;  %1004 = vmatmul.mubr.bf16.gmra.mrb[28].mxu1 %v1623_v46 }
  0xd2   : > { %1423 = vmatprep.mubr.msk.bf16.mxu0 %vm683_vm0, %v1624_v47  ;;  %1439 = vmatprep.mubr.msk.bf16.mxu1 %vm683_vm0, %v1626_v48 }
  0xd9   : > { %884 = vmatmul.mubr.bf16.gmra.mrb[32].mxu0 %v1628_v49  ;;  %1012 = vmatmul.mubr.bf16.gmra.mrb[32].mxu1 %v1629_v50 }
  0xda   : > { %1424 = vmatprep.mubr.msk.bf16.mxu0 %vm683_vm0, %v1630_v51  ;;  %1440 = vmatprep.mubr.msk.bf16.mxu1 %vm683_vm0, %v1632_v52 }
  0xe1   : > { %892 = vmatmul.mubr.bf16.gmra.mrb[36].mxu0 %v1634_v53  ;;  %1020 = vmatmul.mubr.bf16.gmra.mrb[36].mxu1 %v1635_v54 }
  0xe2   : > { %1425 = vmatprep.mubr.msk.bf16.mxu0 %vm683_vm0, %v1636_v55  ;;  %1441 = vmatprep.mubr.msk.bf16.mxu1 %vm683_vm0, %v1638_v56 }
  0xe9   : > { %900 = vmatmul.mubr.bf16.gmra.mrb[40].mxu0 %v1640_v57  ;;  %1028 = vmatmul.mubr.bf16.gmra.mrb[40].mxu1 %v1641_v58 }
  0xea   : > { %1426 = vmatprep.mubr.msk.bf16.mxu0 %vm683_vm0, %v1642_v59  ;;  %1442 = vmatprep.mubr.msk.bf16.mxu1 %vm683_vm0, %v1644_v60 }
  0xf1   : > { %908 = vmatmul.mubr.bf16.gmra.mrb[44].mxu0 %v1646_v61  ;;  %1036 = vmatmul.mubr.bf16.gmra.mrb[44].mxu1 %v1647_v62 }
  0xf2   : > { %1427 = vmatprep.mubr.msk.bf16.mxu0 %vm683_vm0, %v1648_v63  ;;  %1443 = vmatprep.mubr.msk.bf16.mxu1 %vm683_vm0, %v1650_v0 }
  0xf9   : > { %916 = vmatmul.mubr.bf16.gmra.mrb[48].mxu0 %v1652_v1  ;;  %1044 = vmatmul.mubr.bf16.gmra.mrb[48].mxu1 %v1653_v2 }
  0xfa   : > { %1428 = vmatprep.mubr.msk.bf16.mxu0 %vm683_vm0, %v1654_v3  ;;  %1444 = vmatprep.mubr.msk.bf16.mxu1 %vm683_vm0, %v1656_v4 }
 0x101   : > { %924 = vmatmul.mubr.bf16.gmra.mrb[52].mxu0 %v1658_v5  ;;  %1052 = vmatmul.mubr.bf16.gmra.mrb[52].mxu1 %v1659_v6 }
 0x102   : > { %1429 = vmatprep.mubr.msk.bf16.mxu0 %vm683_vm0, %v1660_v7  ;;  %1445 = vmatprep.mubr.msk.bf16.mxu1 %vm683_vm0, %v1662_v8 }
 0x109   : > { %932 = vmatmul.mubr.bf16.gmra.mrb[56].mxu0 %v1664_v9  ;;  %1060 = vmatmul.mubr.bf16.gmra.mrb[56].mxu1 %v1665_v10 }
 0x10a   : > { %1430 = vmatprep.mubr.msk.bf16.mxu0 %vm683_vm0, %v1666_v11  ;;  %1446 = vmatprep.mubr.msk.bf16.mxu1 %vm683_vm0, %v1668_v12 }
 0x111   : > { %940 = vmatmul.mubr.bf16.gmra.mrb[60].mxu0 %v1670_v13  ;;  %1068 = vmatmul.mubr.bf16.gmra.mrb[60].mxu1 %v1671_v14 }
 0x16c   : > { %v821_v16 = vpop.f32.mrb[0].mxu0  ;;  %v949_v17 = vpop.f32.mrb[0].mxu1 }
 0x16d   : > { %v822_v18 = vadd.f32 %v2171_v15, %v821_v16  ;;  %v950_v19 = vadd.f32 %v2171_v15, %v949_v17  ;;  %v823_v20 = vpop.f32.mrb[1].mxu0  ;;  %v951_v21 = vpop.f32.mrb[1].mxu1 }
 0x16e   : > { %v824_v22 = vpop.f32.mrb[2].mxu0  ;;  %v952_v23 = vpop.f32.mrb[2].mxu1 }
 0x16f   : > { %v1076_v24 = vmax.f32 %v822_v18, 0.0  ;;  %v1108_v25 = vmax.f32 %v950_v19, 0.0  ;;  %v825_v26 = vadd.f32 %v2171_v15, %v824_v22  ;;  %v953_v27 = vadd.f32 %v2171_v15, %v952_v23  ;;  %v826_v28 = vpop.f32.mrb[3].mxu0  ;;  %v954_v29 = vpop.f32.mrb[3].mxu1 }
 0x171   : > { %1140 = vst [vmem:[%s2179_s20] sm:$0xff] %v1076_v24  ;;  %1172 = vst [vmem:[%s2179_s20 + $0x100] sm:$0xff] %v1108_v25  ;;  %v1077_v30 = vmax.f32 %v825_v26, 0.0  ;;  %v1109_v31 = vmax.f32 %v953_v27, 0.0 }
 0x173   : > { %1141 = vst [vmem:[%s2179_s20 + $0x8] sm:$0xff] %v1077_v30  ;;  %1173 = vst [vmem:[%s2179_s20 + $0x108] sm:$0xff] %v1109_v31 }
 0x174   : > { %v829_v32 = vpop.f32.mrb[4].mxu0  ;;  %v957_v33 = vpop.f32.mrb[4].mxu1 }
 0x175   : > { %v830_v34 = vadd.f32 %v2171_v15, %v829_v32  ;;  %v958_v35 = vadd.f32 %v2171_v15, %v957_v33  ;;  %v831_v36 = vpop.f32.mrb[5].mxu0  ;;  %v959_v37 = vpop.f32.mrb[5].mxu1 }
 0x176   : > { %v832_v38 = vpop.f32.mrb[6].mxu0  ;;  %v960_v39 = vpop.f32.mrb[6].mxu1 }
 0x177   : > { %v1078_v40 = vmax.f32 %v830_v34, 0.0  ;;  %v1110_v41 = vmax.f32 %v958_v35, 0.0  ;;  %v833_v42 = vadd.f32 %v2171_v15, %v832_v38  ;;  %v961_v43 = vadd.f32 %v2171_v15, %v960_v39  ;;  %v834_v44 = vpop.f32.mrb[7].mxu0  ;;  %v962_v45 = vpop.f32.mrb[7].mxu1 }
 0x179   : > { %1142 = vst [vmem:[%s2179_s20 + $0x10] sm:$0xff] %v1078_v40  ;;  %1174 = vst [vmem:[%s2179_s20 + $0x110] sm:$0xff] %v1110_v41  ;;  %v1079_v46 = vmax.f32 %v833_v42, 0.0  ;;  %v1111_v47 = vmax.f32 %v961_v43, 0.0 }
 0x17b   : > { %1143 = vst [vmem:[%s2179_s20 + $0x18] sm:$0xff] %v1079_v46  ;;  %1175 = vst [vmem:[%s2179_s20 + $0x118] sm:$0xff] %v1111_v47 }
 0x17c   : > { %v837_v48 = vpop.f32.mrb[8].mxu0  ;;  %v965_v49 = vpop.f32.mrb[8].mxu1 }
 0x17d   : > { %v838_v50 = vadd.f32 %v2171_v15, %v837_v48  ;;  %v966_v51 = vadd.f32 %v2171_v15, %v965_v49  ;;  %v839_v52 = vpop.f32.mrb[9].mxu0  ;;  %v967_v53 = vpop.f32.mrb[9].mxu1 }
 0x17e   : > { %v840_v54 = vpop.f32.mrb[10].mxu0  ;;  %v968_v55 = vpop.f32.mrb[10].mxu1 }
 0x17f   : > { %v1080_v56 = vmax.f32 %v838_v50, 0.0  ;;  %v1112_v57 = vmax.f32 %v966_v51, 0.0  ;;  %v841_v58 = vadd.f32 %v2171_v15, %v840_v54  ;;  %v969_v59 = vadd.f32 %v2171_v15, %v968_v55  ;;  %v842_v60 = vpop.f32.mrb[11].mxu0  ;;  %v970_v61 = vpop.f32.mrb[11].mxu1 }
 0x181   : > { %1144 = vst [vmem:[%s2179_s20 + $0x20] sm:$0xff] %v1080_v56  ;;  %1176 = vst [vmem:[%s2179_s20 + $0x120] sm:$0xff] %v1112_v57  ;;  %v1081_v62 = vmax.f32 %v841_v58, 0.0  ;;  %v1113_v63 = vmax.f32 %v969_v59, 0.0 }
 0x183   : > { %1145 = vst [vmem:[%s2179_s20 + $0x28] sm:$0xff] %v1081_v62  ;;  %1177 = vst [vmem:[%s2179_s20 + $0x128] sm:$0xff] %v1113_v63 }
 0x184   : > { %v845_v0 = vpop.f32.mrb[12].mxu0  ;;  %v973_v1 = vpop.f32.mrb[12].mxu1 }
 0x185   : > { %v846_v2 = vadd.f32 %v2171_v15, %v845_v0  ;;  %v974_v3 = vadd.f32 %v2171_v15, %v973_v1  ;;  %v847_v4 = vpop.f32.mrb[13].mxu0  ;;  %v975_v5 = vpop.f32.mrb[13].mxu1 }
 0x186   : > { %v848_v6 = vpop.f32.mrb[14].mxu0  ;;  %v976_v7 = vpop.f32.mrb[14].mxu1 }
 0x187   : > { %v1082_v8 = vmax.f32 %v846_v2, 0.0  ;;  %v1114_v9 = vmax.f32 %v974_v3, 0.0  ;;  %v849_v10 = vadd.f32 %v2171_v15, %v848_v6  ;;  %v977_v11 = vadd.f32 %v2171_v15, %v976_v7  ;;  %v850_v12 = vpop.f32.mrb[15].mxu0  ;;  %v978_v13 = vpop.f32.mrb[15].mxu1 }
 0x189   : > { %1146 = vst [vmem:[%s2179_s20 + $0x30] sm:$0xff] %v1082_v8  ;;  %1178 = vst [vmem:[%s2179_s20 + $0x130] sm:$0xff] %v1114_v9  ;;  %v1083_v14 = vmax.f32 %v849_v10, 0.0  ;;  %v1115_v16 = vmax.f32 %v977_v11, 0.0 }
 0x18b   : > { %1147 = vst [vmem:[%s2179_s20 + $0x38] sm:$0xff] %v1083_v14  ;;  %1179 = vst [vmem:[%s2179_s20 + $0x138] sm:$0xff] %v1115_v16 }
 0x18c   : > { %v853_v17 = vpop.f32.mrb[16].mxu0  ;;  %v981_v18 = vpop.f32.mrb[16].mxu1 }
 0x18d   : > { %v854_v19 = vadd.f32 %v2171_v15, %v853_v17  ;;  %v982_v20 = vadd.f32 %v2171_v15, %v981_v18  ;;  %v855_v21 = vpop.f32.mrb[17].mxu0  ;;  %v983_v22 = vpop.f32.mrb[17].mxu1 }
 0x18e   : > { %v856_v23 = vpop.f32.mrb[18].mxu0  ;;  %v984_v24 = vpop.f32.mrb[18].mxu1 }
 0x18f   : > { %v1084_v25 = vmax.f32 %v854_v19, 0.0  ;;  %v1116_v26 = vmax.f32 %v982_v20, 0.0  ;;  %v857_v27 = vadd.f32 %v2171_v15, %v856_v23  ;;  %v985_v28 = vadd.f32 %v2171_v15, %v984_v24  ;;  %v858_v29 = vpop.f32.mrb[19].mxu0  ;;  %v986_v30 = vpop.f32.mrb[19].mxu1 }
 0x191   : > { %1148 = vst [vmem:[%s2179_s20 + $0x40] sm:$0xff] %v1084_v25  ;;  %1180 = vst [vmem:[%s2179_s20 + $0x140] sm:$0xff] %v1116_v26  ;;  %v1085_v31 = vmax.f32 %v857_v27, 0.0  ;;  %v1117_v32 = vmax.f32 %v985_v28, 0.0 }
 0x193   : > { %1149 = vst [vmem:[%s2179_s20 + $0x48] sm:$0xff] %v1085_v31  ;;  %1181 = vst [vmem:[%s2179_s20 + $0x148] sm:$0xff] %v1117_v32 }
 0x194   : > { %v861_v33 = vpop.f32.mrb[20].mxu0  ;;  %v989_v34 = vpop.f32.mrb[20].mxu1 }
 0x195   : > { %v862_v35 = vadd.f32 %v2171_v15, %v861_v33  ;;  %v990_v36 = vadd.f32 %v2171_v15, %v989_v34  ;;  %v863_v37 = vpop.f32.mrb[21].mxu0  ;;  %v991_v38 = vpop.f32.mrb[21].mxu1 }
 0x196   : > { %v864_v39 = vpop.f32.mrb[22].mxu0  ;;  %v992_v40 = vpop.f32.mrb[22].mxu1 }
 0x197   : > { %v1086_v41 = vmax.f32 %v862_v35, 0.0  ;;  %v1118_v42 = vmax.f32 %v990_v36, 0.0  ;;  %v865_v43 = vadd.f32 %v2171_v15, %v864_v39  ;;  %v993_v44 = vadd.f32 %v2171_v15, %v992_v40  ;;  %v866_v45 = vpop.f32.mrb[23].mxu0  ;;  %v994_v46 = vpop.f32.mrb[23].mxu1 }
 0x199   : > { %1150 = vst [vmem:[%s2179_s20 + $0x50] sm:$0xff] %v1086_v41  ;;  %1182 = vst [vmem:[%s2179_s20 + $0x150] sm:$0xff] %v1118_v42  ;;  %v1087_v47 = vmax.f32 %v865_v43, 0.0  ;;  %v1119_v48 = vmax.f32 %v993_v44, 0.0 }
 0x19b   : > { %1151 = vst [vmem:[%s2179_s20 + $0x58] sm:$0xff] %v1087_v47  ;;  %1183 = vst [vmem:[%s2179_s20 + $0x158] sm:$0xff] %v1119_v48 }
 0x19c   : > { %v869_v49 = vpop.f32.mrb[24].mxu0  ;;  %v997_v50 = vpop.f32.mrb[24].mxu1 }
 0x19d   : > { %v870_v51 = vadd.f32 %v2171_v15, %v869_v49  ;;  %v998_v52 = vadd.f32 %v2171_v15, %v997_v50  ;;  %v871_v53 = vpop.f32.mrb[25].mxu0  ;;  %v999_v54 = vpop.f32.mrb[25].mxu1 }
 0x19e   : > { %v872_v55 = vpop.f32.mrb[26].mxu0  ;;  %v1000_v56 = vpop.f32.mrb[26].mxu1 }
 0x19f   : > { %v1088_v57 = vmax.f32 %v870_v51, 0.0  ;;  %v1120_v58 = vmax.f32 %v998_v52, 0.0  ;;  %v873_v59 = vadd.f32 %v2171_v15, %v872_v55  ;;  %v1001_v60 = vadd.f32 %v2171_v15, %v1000_v56  ;;  %v874_v61 = vpop.f32.mrb[27].mxu0  ;;  %v1002_v62 = vpop.f32.mrb[27].mxu1 }
 0x1a1   : > { %1152 = vst [vmem:[%s2179_s20 + $0x60] sm:$0xff] %v1088_v57  ;;  %1184 = vst [vmem:[%s2179_s20 + $0x160] sm:$0xff] %v1120_v58  ;;  %v1089_v63 = vmax.f32 %v873_v59, 0.0  ;;  %v1121_v0 = vmax.f32 %v1001_v60, 0.0 }
 0x1a3   : > { %1153 = vst [vmem:[%s2179_s20 + $0x68] sm:$0xff] %v1089_v63  ;;  %1185 = vst [vmem:[%s2179_s20 + $0x168] sm:$0xff] %v1121_v0 }
 0x1a4   : > { %v877_v1 = vpop.f32.mrb[28].mxu0  ;;  %v1005_v2 = vpop.f32.mrb[28].mxu1 }
 0x1a5   : > { %v878_v3 = vadd.f32 %v2171_v15, %v877_v1  ;;  %v1006_v4 = vadd.f32 %v2171_v15, %v1005_v2  ;;  %v879_v5 = vpop.f32.mrb[29].mxu0  ;;  %v1007_v6 = vpop.f32.mrb[29].mxu1 }
 0x1a6   : > { %v880_v7 = vpop.f32.mrb[30].mxu0  ;;  %v1008_v8 = vpop.f32.mrb[30].mxu1 }
 0x1a7   : > { %v1090_v9 = vmax.f32 %v878_v3, 0.0  ;;  %v1122_v10 = vmax.f32 %v1006_v4, 0.0  ;;  %v881_v11 = vadd.f32 %v2171_v15, %v880_v7  ;;  %v1009_v12 = vadd.f32 %v2171_v15, %v1008_v8  ;;  %v882_v13 = vpop.f32.mrb[31].mxu0  ;;  %v1010_v14 = vpop.f32.mrb[31].mxu1 }
 0x1a9   : > { %1154 = vst [vmem:[%s2179_s20 + $0x70] sm:$0xff] %v1090_v9  ;;  %1186 = vst [vmem:[%s2179_s20 + $0x170] sm:$0xff] %v1122_v10  ;;  %v1091_v16 = vmax.f32 %v881_v11, 0.0  ;;  %v1123_v17 = vmax.f32 %v1009_v12, 0.0 }
 0x1ab   : > { %1155 = vst [vmem:[%s2179_s20 + $0x78] sm:$0xff] %v1091_v16  ;;  %1187 = vst [vmem:[%s2179_s20 + $0x178] sm:$0xff] %v1123_v17 }
 0x1ac   : > { %v885_v18 = vpop.f32.mrb[32].mxu0  ;;  %v1013_v19 = vpop.f32.mrb[32].mxu1 }
 0x1ad   : > { %v886_v20 = vadd.f32 %v2171_v15, %v885_v18  ;;  %v1014_v21 = vadd.f32 %v2171_v15, %v1013_v19  ;;  %v887_v22 = vpop.f32.mrb[33].mxu0  ;;  %v1015_v23 = vpop.f32.mrb[33].mxu1 }
 0x1ae   : > { %v888_v24 = vpop.f32.mrb[34].mxu0  ;;  %v1016_v25 = vpop.f32.mrb[34].mxu1 }
 0x1af   : > { %v1092_v26 = vmax.f32 %v886_v20, 0.0  ;;  %v1124_v27 = vmax.f32 %v1014_v21, 0.0  ;;  %v889_v28 = vadd.f32 %v2171_v15, %v888_v24  ;;  %v1017_v29 = vadd.f32 %v2171_v15, %v1016_v25  ;;  %v890_v30 = vpop.f32.mrb[35].mxu0  ;;  %v1018_v31 = vpop.f32.mrb[35].mxu1 }
 0x1b1   : > { %1156 = vst [vmem:[%s2179_s20 + $0x80] sm:$0xff] %v1092_v26  ;;  %1188 = vst [vmem:[%s2179_s20 + $0x180] sm:$0xff] %v1124_v27  ;;  %v1093_v32 = vmax.f32 %v889_v28, 0.0  ;;  %v1125_v33 = vmax.f32 %v1017_v29, 0.0 }
 0x1b3   : > { %1157 = vst [vmem:[%s2179_s20 + $0x88] sm:$0xff] %v1093_v32  ;;  %1189 = vst [vmem:[%s2179_s20 + $0x188] sm:$0xff] %v1125_v33 }
 0x1b4   : > { %v893_v34 = vpop.f32.mrb[36].mxu0  ;;  %v1021_v35 = vpop.f32.mrb[36].mxu1 }
 0x1b5   : > { %v894_v36 = vadd.f32 %v2171_v15, %v893_v34  ;;  %v1022_v37 = vadd.f32 %v2171_v15, %v1021_v35  ;;  %v895_v38 = vpop.f32.mrb[37].mxu0  ;;  %v1023_v39 = vpop.f32.mrb[37].mxu1 }
 0x1b6   : > { %v896_v40 = vpop.f32.mrb[38].mxu0  ;;  %v1024_v41 = vpop.f32.mrb[38].mxu1 }
 0x1b7   : > { %v1094_v42 = vmax.f32 %v894_v36, 0.0  ;;  %v1126_v43 = vmax.f32 %v1022_v37, 0.0  ;;  %v897_v44 = vadd.f32 %v2171_v15, %v896_v40  ;;  %v1025_v45 = vadd.f32 %v2171_v15, %v1024_v41  ;;  %v898_v46 = vpop.f32.mrb[39].mxu0  ;;  %v1026_v47 = vpop.f32.mrb[39].mxu1 }
 0x1b9   : > { %1158 = vst [vmem:[%s2179_s20 + $0x90] sm:$0xff] %v1094_v42  ;;  %1190 = vst [vmem:[%s2179_s20 + $0x190] sm:$0xff] %v1126_v43  ;;  %v1095_v48 = vmax.f32 %v897_v44, 0.0  ;;  %v1127_v49 = vmax.f32 %v1025_v45, 0.0 }
 0x1bb   : > { %1159 = vst [vmem:[%s2179_s20 + $0x98] sm:$0xff] %v1095_v48  ;;  %1191 = vst [vmem:[%s2179_s20 + $0x198] sm:$0xff] %v1127_v49 }
 0x1bc   : > { %v901_v50 = vpop.f32.mrb[40].mxu0  ;;  %v1029_v51 = vpop.f32.mrb[40].mxu1 }
 0x1bd   : > { %v902_v52 = vadd.f32 %v2171_v15, %v901_v50  ;;  %v1030_v53 = vadd.f32 %v2171_v15, %v1029_v51  ;;  %v903_v54 = vpop.f32.mrb[41].mxu0  ;;  %v1031_v55 = vpop.f32.mrb[41].mxu1 }
 0x1be   : > { %v904_v56 = vpop.f32.mrb[42].mxu0  ;;  %v1032_v57 = vpop.f32.mrb[42].mxu1 }
 0x1bf   : > { %v1096_v58 = vmax.f32 %v902_v52, 0.0  ;;  %v1128_v59 = vmax.f32 %v1030_v53, 0.0  ;;  %v905_v60 = vadd.f32 %v2171_v15, %v904_v56  ;;  %v1033_v61 = vadd.f32 %v2171_v15, %v1032_v57  ;;  %v906_v62 = vpop.f32.mrb[43].mxu0  ;;  %v1034_v63 = vpop.f32.mrb[43].mxu1 }
 0x1c1   : > { %1160 = vst [vmem:[%s2179_s20 + $0xa0] sm:$0xff] %v1096_v58  ;;  %1192 = vst [vmem:[%s2179_s20 + $0x1a0] sm:$0xff] %v1128_v59  ;;  %v1097_v0 = vmax.f32 %v905_v60, 0.0  ;;  %v1129_v1 = vmax.f32 %v1033_v61, 0.0 }
 0x1c3   : > { %1161 = vst [vmem:[%s2179_s20 + $0xa8] sm:$0xff] %v1097_v0  ;;  %1193 = vst [vmem:[%s2179_s20 + $0x1a8] sm:$0xff] %v1129_v1 }
 0x1c4   : > { %v909_v2 = vpop.f32.mrb[44].mxu0  ;;  %v1037_v3 = vpop.f32.mrb[44].mxu1 }
 0x1c5   : > { %v910_v4 = vadd.f32 %v2171_v15, %v909_v2  ;;  %v1038_v5 = vadd.f32 %v2171_v15, %v1037_v3  ;;  %v911_v6 = vpop.f32.mrb[45].mxu0  ;;  %v1039_v7 = vpop.f32.mrb[45].mxu1 }
 0x1c6   : > { %v912_v8 = vpop.f32.mrb[46].mxu0  ;;  %v1040_v9 = vpop.f32.mrb[46].mxu1 }
 0x1c7   : > { %v1098_v10 = vmax.f32 %v910_v4, 0.0  ;;  %v1130_v11 = vmax.f32 %v1038_v5, 0.0  ;;  %v913_v12 = vadd.f32 %v2171_v15, %v912_v8  ;;  %v1041_v13 = vadd.f32 %v2171_v15, %v1040_v9  ;;  %v914_v14 = vpop.f32.mrb[47].mxu0  ;;  %v1042_v16 = vpop.f32.mrb[47].mxu1 }
 0x1c9   : > { %1162 = vst [vmem:[%s2179_s20 + $0xb0] sm:$0xff] %v1098_v10  ;;  %1194 = vst [vmem:[%s2179_s20 + $0x1b0] sm:$0xff] %v1130_v11  ;;  %v1099_v17 = vmax.f32 %v913_v12, 0.0  ;;  %v1131_v18 = vmax.f32 %v1041_v13, 0.0 }
 0x1cb   : > { %1163 = vst [vmem:[%s2179_s20 + $0xb8] sm:$0xff] %v1099_v17  ;;  %1195 = vst [vmem:[%s2179_s20 + $0x1b8] sm:$0xff] %v1131_v18 }
 0x1cc   : > { %v917_v19 = vpop.f32.mrb[48].mxu0  ;;  %v1045_v20 = vpop.f32.mrb[48].mxu1 }
 0x1cd   : > { %v918_v21 = vadd.f32 %v2171_v15, %v917_v19  ;;  %v1046_v22 = vadd.f32 %v2171_v15, %v1045_v20  ;;  %v919_v23 = vpop.f32.mrb[49].mxu0  ;;  %v1047_v24 = vpop.f32.mrb[49].mxu1 }
 0x1ce   : > { %v920_v25 = vpop.f32.mrb[50].mxu0  ;;  %v1048_v26 = vpop.f32.mrb[50].mxu1 }
 0x1cf   : > { %v1100_v27 = vmax.f32 %v918_v21, 0.0  ;;  %v1132_v28 = vmax.f32 %v1046_v22, 0.0  ;;  %v921_v29 = vadd.f32 %v2171_v15, %v920_v25  ;;  %v1049_v30 = vadd.f32 %v2171_v15, %v1048_v26  ;;  %v922_v31 = vpop.f32.mrb[51].mxu0  ;;  %v1050_v32 = vpop.f32.mrb[51].mxu1 }
 0x1d1   : > { %1164 = vst [vmem:[%s2179_s20 + $0xc0] sm:$0xff] %v1100_v27  ;;  %1196 = vst [vmem:[%s2179_s20 + $0x1c0] sm:$0xff] %v1132_v28  ;;  %v1101_v33 = vmax.f32 %v921_v29, 0.0  ;;  %v1133_v34 = vmax.f32 %v1049_v30, 0.0 }
 0x1d3   : > { %1165 = vst [vmem:[%s2179_s20 + $0xc8] sm:$0xff] %v1101_v33  ;;  %1197 = vst [vmem:[%s2179_s20 + $0x1c8] sm:$0xff] %v1133_v34 }
 0x1d4   : > { %v925_v35 = vpop.f32.mrb[52].mxu0  ;;  %v1053_v36 = vpop.f32.mrb[52].mxu1 }
 0x1d5   : > { %v926_v37 = vadd.f32 %v2171_v15, %v925_v35  ;;  %v1054_v38 = vadd.f32 %v2171_v15, %v1053_v36  ;;  %v927_v39 = vpop.f32.mrb[53].mxu0  ;;  %v1055_v40 = vpop.f32.mrb[53].mxu1 }
 0x1d6   : > { %v928_v41 = vpop.f32.mrb[54].mxu0  ;;  %v1056_v42 = vpop.f32.mrb[54].mxu1 }
 0x1d7   : > { %v1102_v43 = vmax.f32 %v926_v37, 0.0  ;;  %v1134_v44 = vmax.f32 %v1054_v38, 0.0  ;;  %v929_v45 = vadd.f32 %v2171_v15, %v928_v41  ;;  %v1057_v46 = vadd.f32 %v2171_v15, %v1056_v42  ;;  %v930_v47 = vpop.f32.mrb[55].mxu0  ;;  %v1058_v48 = vpop.f32.mrb[55].mxu1 }
 0x1d9   : > { %1166 = vst [vmem:[%s2179_s20 + $0xd0] sm:$0xff] %v1102_v43  ;;  %1198 = vst [vmem:[%s2179_s20 + $0x1d0] sm:$0xff] %v1134_v44  ;;  %v1103_v49 = vmax.f32 %v929_v45, 0.0  ;;  %v1135_v50 = vmax.f32 %v1057_v46, 0.0 }
 0x1db   : > { %1167 = vst [vmem:[%s2179_s20 + $0xd8] sm:$0xff] %v1103_v49  ;;  %1199 = vst [vmem:[%s2179_s20 + $0x1d8] sm:$0xff] %v1135_v50 }
 0x1dc   : > { %v933_v51 = vpop.f32.mrb[56].mxu0  ;;  %v1061_v52 = vpop.f32.mrb[56].mxu1 }
 0x1dd   : > { %v934_v53 = vadd.f32 %v2171_v15, %v933_v51  ;;  %v1062_v54 = vadd.f32 %v2171_v15, %v1061_v52  ;;  %v935_v55 = vpop.f32.mrb[57].mxu0  ;;  %v1063_v56 = vpop.f32.mrb[57].mxu1 }
 0x1de   : > { %v936_v57 = vpop.f32.mrb[58].mxu0  ;;  %v1064_v58 = vpop.f32.mrb[58].mxu1 }
 0x1df   : > { %v1104_v59 = vmax.f32 %v934_v53, 0.0  ;;  %v1136_v60 = vmax.f32 %v1062_v54, 0.0  ;;  %v937_v61 = vadd.f32 %v2171_v15, %v936_v57  ;;  %v1065_v62 = vadd.f32 %v2171_v15, %v1064_v58  ;;  %v938_v63 = vpop.f32.mrb[59].mxu0  ;;  %v1066_v0 = vpop.f32.mrb[59].mxu1 }
 0x1e1   : > { %1168 = vst [vmem:[%s2179_s20 + $0xe0] sm:$0xff] %v1104_v59  ;;  %1200 = vst [vmem:[%s2179_s20 + $0x1e0] sm:$0xff] %v1136_v60  ;;  %v1105_v1 = vmax.f32 %v937_v61, 0.0  ;;  %v1137_v2 = vmax.f32 %v1065_v62, 0.0 }
 0x1e3   : > { %1169 = vst [vmem:[%s2179_s20 + $0xe8] sm:$0xff] %v1105_v1  ;;  %1201 = vst [vmem:[%s2179_s20 + $0x1e8] sm:$0xff] %v1137_v2 }
 0x1e4   : > { %v941_v3 = vpop.f32.mrb[60].mxu0  ;;  %v1069_v4 = vpop.f32.mrb[60].mxu1 }
 0x1e5   : > { %v942_v5 = vadd.f32 %v2171_v15, %v941_v3  ;;  %v1070_v6 = vadd.f32 %v2171_v15, %v1069_v4  ;;  %v943_v7 = vpop.f32.mrb[61].mxu0  ;;  %v1071_v8 = vpop.f32.mrb[61].mxu1 }
 0x1e6   : > { %v944_v9 = vpop.f32.mrb[62].mxu0  ;;  %v1072_v10 = vpop.f32.mrb[62].mxu1 }
 0x1e7   : > { %v1106_v11 = vmax.f32 %v942_v5, 0.0  ;;  %v1138_v12 = vmax.f32 %v1070_v6, 0.0  ;;  %v945_v13 = vadd.f32 %v2171_v15, %v944_v9  ;;  %v1073_v14 = vadd.f32 %v2171_v15, %v1072_v10  ;;  %v946_v16 = vpop.f32.mrb[63].mxu0  ;;  %v1074_v17 = vpop.f32.mrb[63].mxu1 }
 0x1e9   : > { %1170 = vst [vmem:[%s2179_s20 + $0xf0] sm:$0xff] %v1106_v11  ;;  %1202 = vst [vmem:[%s2179_s20 + $0x1f0] sm:$0xff] %v1138_v12  ;;  %v1107_v18 = vmax.f32 %v945_v13, 0.0  ;;  %v1139_v19 = vmax.f32 %v1073_v14, 0.0 }
 0x1eb   : > { %1171 = vst [vmem:[%s2179_s20 + $0xf8] sm:$0xff] %v1107_v18  ;;  %1203 = vst [vmem:[%s2179_s20 + $0x1f8] sm:$0xff] %v1139_v19 }
 0x1ec   : > { %1771 = shalt.err (!%p1768_p5)
}
 0x1ed   : > { %s1772_s21 = scalar_lea.hbm %s2306_s26, 8192  ;;  %s1776_s25 = scalar_lea.hbm %s2363_s3, 32768 }
 0x1ee   : > { %p1773_p9 = scmp.ne.s32.totalorder %s2306_s26, %s1772_s21  ;;  %p1777_p3 = scmp.lt.u32.totalorder %s2306_s26, %s2363_s3 }
 0x1ef   : > { %p1778_p7 = scmp.lt.u32.totalorder %s1776_s25, %s1772_s21  ;;  %p1780_p1 = scmp.lt.u32.totalorder %s1772_s21, %s2306_s26 }
 0x1f0   : > { %p1774_p12 = pnand %p1773_p9, %p2004_p8 }
 0x1f1   : > { %p1779_p10 = por %p1778_p7, %p1777_p3 }
 0x1f2   : > { %p1775_p11 = pneg %p1774_p12 }
 0x1f3   : > { %p1781_p2 = por %p1780_p1, %p1779_p10 }
 0x1f5   : > { %p1782_p4 = pnand %p1781_p2, %p1775_p11 }
 0x1f7   : > { %1785 = shalt.err (!%p1782_p4)
}
 0x1f8   : > { %s1856_s20 = smov 128   ;;  %s1857_s22 = smov 8  }
 0x1f9   : > { %1485 = dma.vmem_to_hbm [thread:$0]  (%p2004_p8), %s2308_s24, 8192, %s2306_s26, %s1205_s15, %s1856_s20, %s1856_s20, %s1857_s22  }
 0x1fa PF: > { %p1507_p6 = scmp.ge.s32.totalorder %s1844_s17, 2  ;;  %s1234_s7 = sand.u32 1, %s1824_s12  }
 0x1fb   : > { %p2380_p13 = scmp.ne.s32.totalorder %s2371_s23, 0  ;;  %s1235_s8 = scalar_lea.sflag [#allocation4], %s1234_s7 }
 0x1fd   : > { %p1499_p0 = pnand %p1507_p6, %p2380_p13 }
 0x1ff   : > { %1819 = dma.done.wait (!%p1499_p0), %s1235_s8, 8192  }
 0x200   : > { %1821 = vsyncadd (!%p1499_p0), %s1235_s8, 4294959104  ;;  %s20_s17 = sadd.s32 1, %s1844_s17   ;;  %s2381_s12 = smov %s1828_s13 }
 0x201   : > { %p17_p5 = scmp.ge.s32.totalorder %s20_s17, 6   ;;  %s2382_s13 = smov %s1832_s14 }
 0x202   : > { %s2383_s14 = smov %s2013_s4  ;;  %s2384_s15 = smov %s1840_s16 }
 0x203   : > { %s2385_s16 = smov %s2387_s18  ;;  %19 = sbr.rel (!%p17_p5) target bundleno = 7 (0x7), region = 87 }
 0x20a   :  { %1240 = vsyncpa [#allocation3], 1 }
 0x20b   :  { %1242 = vsyncpa [#allocation3 + $0x1], 1 }
 0x20c   :  { %1243 = vsyncpa [#allocation6], 1 }
 0x20d   :  { %1244 = vsyncpa [#allocation4], 1 }
 0x20e   :  { %1246 = vsyncpa [#allocation4 + $0x1], 1 }

</bundles_post_ra>
